<compile_context>
chip_gen: v5e
topology: v5e:2x2
jax: 0.10.0
libtpu: 0.0.40
codegen_flags: <defaults>
</compile_context>

<pallas_src>
import jax
import jax.numpy as jnp
from jax import lax
from jax.experimental import pallas as pl
from jax.experimental.pallas import tpu as pltpu


def _round_up(x, m):
    return (x + m - 1) // m * m


def _wz_kernel(w_ref, z_ref, m_ref):
    # M = W @ Zs.T as a contraction over the shared daction axis
    # (avoids an XLU transpose / VMEM copy of Zs inside the kernel).
    m_ref[...] = lax.dot_general(
        w_ref[...], z_ref[...],
        dimension_numbers=(((1,), (1,)), ((), ())),
        preferred_element_type=jnp.float32,
    ).astype(m_ref.dtype)


def _xm_kernel(x_ref, m_ref, o_ref):
    # One MXU GEMM per grid step: (TB, dobs) @ (dobs, n_pad) -> (TB, n_pad)
    o_ref[...] = jnp.dot(
        x_ref[...], m_ref[...], preferred_element_type=jnp.float32
    ).astype(o_ref.dtype)


def bilinear_forward(Xs, W, Zs, *, tb=256, compute_dtype=None):
    """out[b, a] = sum_{i,j} Xs[b, i] * W[i, j] * Zs[a, j]."""
    B, dobs = Xs.shape
    naction, daction = Zs.shape
    assert W.shape == (dobs, daction)
    out_dtype = Xs.dtype
    # Optional lower-precision MXU operands (e.g. jnp.bfloat16 on v6e/v7x);
    # default keeps the input dtype so results match the f32 reference tightly.
    cdtype = compute_dtype if compute_dtype is not None else Xs.dtype

    # ---- wrapper-side layout plumbing (no extra math) ---------------------
    # Lane-dense output: pad the action axis to a multiple of 128.
    n_pad = _round_up(max(naction, 128), 128)
    Zs_p = Zs if n_pad == naction else jnp.pad(Zs, ((0, n_pad - naction), (0, 0)))

    # Batch tile: multiple of 8 (sublane), capped at `tb`; pad B to a multiple.
    tb_eff = min(tb, _round_up(B, 8))
    B_pad = _round_up(B, tb_eff)
    Xs_p = Xs if B_pad == B else jnp.pad(Xs, ((0, B_pad - B), (0, 0)))

    Xs_p = Xs_p.astype(cdtype)
    W_c = W.astype(cdtype)
    Zs_c = Zs_p.astype(cdtype)

    # ---- step 1: hoist the batch-independent M = W @ Zs.T -----------------
    M = pl.pallas_call(
        _wz_kernel,
        out_shape=jax.ShapeDtypeStruct((dobs, n_pad), cdtype),
        grid_spec=pl.GridSpec(
            grid=(1,),
            in_specs=[
                pl.BlockSpec((dobs, daction), lambda i: (0, 0)),
                pl.BlockSpec((n_pad, daction), lambda i: (0, 0)),
            ],
            out_specs=pl.BlockSpec((dobs, n_pad), lambda i: (0, 0)),
        ),
        compiler_params=pltpu.CompilerParams(
            dimension_semantics=("arbitrary",)),
    )(W_c, Zs_c)

    # ---- step 2: single streamed GEMM, tiled over the batch dim -----------
    out_p = pl.pallas_call(
        _xm_kernel,
        out_shape=jax.ShapeDtypeStruct((B_pad, n_pad), out_dtype),
        grid_spec=pl.GridSpec(
            grid=(B_pad // tb_eff,),
            in_specs=[
                pl.BlockSpec((tb_eff, dobs), lambda i: (i, 0)),
                # constant index_map -> M fetched once, VMEM-resident across steps
                pl.BlockSpec((dobs, n_pad), lambda i: (0, 0)),
            ],
            out_specs=pl.BlockSpec((tb_eff, n_pad), lambda i: (i, 0)),
        ),
        compiler_params=pltpu.CompilerParams(
            dimension_semantics=("parallel",)),
    )(Xs_p, M)

    # Slice off batch / action padding.
    return out_p[:B, :naction]


if __name__ == "__main__":
    # Small shapes consistent with the module's forward:
    #   Xs: (B, dobs), Zs: (naction, daction), W: (dobs, daction)
    B, dobs, daction, naction = 8, 32, 16, 8

    key = jax.random.PRNGKey(0)
    kx, kz, kw = jax.random.split(key, 3)
    Xs = jax.random.normal(kx, (B, dobs), dtype=jnp.float32)
    Zs = jax.random.normal(kz, (naction, daction), dtype=jnp.float32)
    # The PyTorch module zero-inits W; random init here so the test is non-trivial.
    W = jax.random.normal(kw, (dobs, daction), dtype=jnp.float32)

    out = bilinear_forward(Xs, W, Zs)
    out = jax.block_until_ready(out)

    ref = Xs @ W @ Zs.T
    assert out.shape == (B, naction)
    assert jnp.allclose(out, ref, atol=1e-4, rtol=1e-4)
    print("KERNEL_OK")
</pallas_src>

<mosaic_0001>
module attributes {stable_mosaic.version = 11 : i64} {
  func.func @_wz_kernel(%arg0: i32, %arg1: memref<32x16xf32, #tpu.memory_space<vmem>>, %arg2: memref<128x16xf32, #tpu.memory_space<vmem>>, %arg3: memref<32x128xf32, #tpu.memory_space<vmem>>) attributes {dimension_semantics = [#tpu.dimension_semantics<arbitrary>], iteration_bounds = array<i64: 1>, scalar_prefetch = 0 : i64, scratch_operands = 0 : i64, tpu.core_type = #tpu.core_type<tc>, window_params = [{pipeline_mode = #tpu.pipeline_mode<synchronous>, transform_indices = @transform_0, window_bounds = array<i64: 32, 16>}, {pipeline_mode = #tpu.pipeline_mode<synchronous>, transform_indices = @transform_1, window_bounds = array<i64: 128, 16>}, {pipeline_mode = #tpu.pipeline_mode<synchronous>, transform_indices = @transform_2, window_bounds = array<i64: 32, 128>}]} {
    %c0 = arith.constant 0 : index
    %c0_0 = arith.constant 0 : index
    %0 = vector.load %arg1[%c0, %c0_0] : memref<32x16xf32, #tpu.memory_space<vmem>>, vector<32x16xf32>
    %c0_1 = arith.constant 0 : index
    %c0_2 = arith.constant 0 : index
    %1 = vector.load %arg2[%c0_1, %c0_2] : memref<128x16xf32, #tpu.memory_space<vmem>>, vector<128x16xf32>
    %cst = arith.constant dense<0.000000e+00> : vector<32x128xf32>
    %2 = tpu.matmul %0, %1, %cst {dimension_numbers = #tpu.dot_dimension_numbers<[1], [1], [0], [0], [0, 0, 1, 0], [], []>} : vector<32x16xf32>, vector<128x16xf32>, vector<32x128xf32> -> vector<32x128xf32>
    %c0_3 = arith.constant 0 : index
    %c0_4 = arith.constant 0 : index
    %3 = vector.load %arg3[%c0_3, %c0_4] : memref<32x128xf32, #tpu.memory_space<vmem>>, vector<32x128xf32>
    tpu.vector_store %arg3[%c0_3, %c0_4], %2 {strides = array<i32>} : memref<32x128xf32, #tpu.memory_space<vmem>>, vector<32x128xf32>,
    return
  }
  func.func @transform_0(%arg0: i32) -> (i32, i32) {
    %c0_i32 = arith.constant 0 : i32
    %c0_i32_0 = arith.constant 0 : i32
    %c0_i32_1 = arith.constant 0 : i32
    return %c0_i32, %c0_i32_0 : i32, i32
  }
  func.func @transform_1(%arg0: i32) -> (i32, i32) {
    %c0_i32 = arith.constant 0 : i32
    %c0_i32_0 = arith.constant 0 : i32
    %c0_i32_1 = arith.constant 0 : i32
    return %c0_i32, %c0_i32_0 : i32, i32
  }
  func.func @transform_2(%arg0: i32) -> (i32, i32) {
    %c0_i32 = arith.constant 0 : i32
    %c0_i32_0 = arith.constant 0 : i32
    %c0_i32_1 = arith.constant 0 : i32
    return %c0_i32, %c0_i32_0 : i32, i32
  }
}

</mosaic_0001>

<bundles_post_ra>
// kernel: tpu_custom_call.1
= control target key start
LH: loop header
LB: loop body
LE: loop exit
PB: predicated region body
PF: predicated region fallthrough
CT: control target
= control target key end

     0   :  { %vm32_vm0 = vcmask 130048   ;;  %s390_s0 = inlined_call_operand.vmem [shape: f32[32,16], index: 0, kind: input, shape index: {}]   ;;  %s391_s1 = inlined_call_operand.vmem [shape: f32[128,16], index: 1, kind: input, shape index: {}]   ;;  %s392_s2 = inlined_call_operand.hbm [shape: f32[32,128], index: 2, kind: output, shape index: {}]  }
   0x1   :  { %v31_v0 = vld [vmem:[%s391_s1 + $0x78] sm:$0xff]  ;;  %v30_v1 = vld [vmem:[%s391_s1 + $0x70] sm:$0xff] }
   0x2   :  { %165 = vmatpush.xpose.msk.msra.mxu2 %vm32_vm0, %v31_v0  ;;  %166 = vmatpush.xpose.msk.msra.mxu3 %vm32_vm0, %v31_v0 }
   0x3   :  { %144 = vmatpush.xpose.msk.msra.mxu0 %vm32_vm0, %v31_v0  ;;  %164 = vmatpush.xpose.msk.msra.mxu1 %vm32_vm0, %v31_v0 }
   0x4   :  { %7 = vsyncpa [#allocation3], 0  ;;  %v29_v2 = vld [vmem:[%s391_s1 + $0x68] sm:$0xff]  ;;  %v28_v3 = vld [vmem:[%s391_s1 + $0x60] sm:$0xff]  ;;  %s241_s20 = smov [#allocation2]   ;;  %s132_s24 = sshll.u32 %s392_s2, 4  ;;  %s133_s24 = int_to_ptr.hbm [resolvable:$true] %s132_s24 }
   0x5   :  { %v27_v4 = vld [vmem:[%s391_s1 + $0x58] sm:$0xff]  ;;  %v26_v5 = vld [vmem:[%s391_s1 + $0x50] sm:$0xff]  ;;  %v25_v6 = vld [vmem:[%s391_s1 + $0x48] sm:$0xff]  ;;  %s130_s21 = sshll.u32 %s241_s20, 4  ;;  %s243_s25 = smov 8   ;;  %s131_s21 = int_to_ptr.vmem [resolvable:$true] %s130_s21 }
   0x6   :  { %168 = vmatpush.xpose.msk.msra.mxu2 %vm32_vm0, %v30_v1  ;;  %169 = vmatpush.xpose.msk.msra.mxu3 %vm32_vm0, %v30_v1  ;;  %v24_v7 = vld [vmem:[%s391_s1 + $0x40] sm:$0xff]  ;;  %v23_v8 = vld [vmem:[%s391_s1 + $0x38] sm:$0xff]  ;;  %v22_v9 = vld [vmem:[%s391_s1 + $0x30] sm:$0xff] }
   0x7   :  { %145 = vmatpush.xpose.msk.msra.mxu0 %vm32_vm0, %v30_v1  ;;  %167 = vmatpush.xpose.msk.msra.mxu1 %vm32_vm0, %v30_v1  ;;  %v21_v10 = vld [vmem:[%s391_s1 + $0x28] sm:$0xff]  ;;  %v20_v11 = vld [vmem:[%s391_s1 + $0x20] sm:$0xff]  ;;  %v19_v12 = vld [vmem:[%s391_s1 + $0x18] sm:$0xff] }
   0x8   :  { %v18_v13 = vld [vmem:[%s391_s1 + $0x10] sm:$0xff]  ;;  %v17_v14 = vld [vmem:[%s391_s1 + $0x8] sm:$0xff]  ;;  %v16_v15 = vld [vmem:[%s391_s1] sm:$0xff] }
   0x9   :  { %v14_v16 = vld [vmem:[%s390_s0 + $0x10] sm:$0xff]  ;;  %v15_v17 = vld [vmem:[%s390_s0 + $0x18] sm:$0xff]  ;;  %v12_v18 = vld [vmem:[%s390_s0] sm:$0xff] }
   0xa   :  { %171 = vmatpush.xpose.msk.msra.mxu2 %vm32_vm0, %v29_v2  ;;  %172 = vmatpush.xpose.msk.msra.mxu3 %vm32_vm0, %v29_v2  ;;  %v13_v19 = vld [vmem:[%s390_s0 + $0x8] sm:$0xff]  ;;  %s242_s0 = smov 128  }
   0xb   :  { %146 = vmatpush.xpose.msk.msra.mxu0 %vm32_vm0, %v29_v2  ;;  %170 = vmatpush.xpose.msk.msra.mxu1 %vm32_vm0, %v29_v2 }
   0xe   :  { %174 = vmatpush.xpose.msk.msra.mxu2 %vm32_vm0, %v28_v3  ;;  %175 = vmatpush.xpose.msk.msra.mxu3 %vm32_vm0, %v28_v3 }
   0xf   :  { %147 = vmatpush.xpose.msk.msra.mxu0 %vm32_vm0, %v28_v3  ;;  %173 = vmatpush.xpose.msk.msra.mxu1 %vm32_vm0, %v28_v3 }
  0x12   :  { %177 = vmatpush.xpose.msk.msra.mxu2 %vm32_vm0, %v27_v4  ;;  %178 = vmatpush.xpose.msk.msra.mxu3 %vm32_vm0, %v27_v4 }
  0x13   :  { %148 = vmatpush.xpose.msk.msra.mxu0 %vm32_vm0, %v27_v4  ;;  %176 = vmatpush.xpose.msk.msra.mxu1 %vm32_vm0, %v27_v4 }
  0x16   :  { %180 = vmatpush.xpose.msk.msra.mxu2 %vm32_vm0, %v26_v5  ;;  %181 = vmatpush.xpose.msk.msra.mxu3 %vm32_vm0, %v26_v5 }
  0x17   :  { %149 = vmatpush.xpose.msk.msra.mxu0 %vm32_vm0, %v26_v5  ;;  %179 = vmatpush.xpose.msk.msra.mxu1 %vm32_vm0, %v26_v5 }
  0x1a   :  { %183 = vmatpush.xpose.msk.msra.mxu2 %vm32_vm0, %v25_v6  ;;  %184 = vmatpush.xpose.msk.msra.mxu3 %vm32_vm0, %v25_v6 }
  0x1b   :  { %150 = vmatpush.xpose.msk.msra.mxu0 %vm32_vm0, %v25_v6  ;;  %182 = vmatpush.xpose.msk.msra.mxu1 %vm32_vm0, %v25_v6 }
  0x1e   :  { %186 = vmatpush.xpose.msk.msra.mxu2 %vm32_vm0, %v24_v7  ;;  %187 = vmatpush.xpose.msk.msra.mxu3 %vm32_vm0, %v24_v7 }
  0x1f   :  { %151 = vmatpush.xpose.msk.msra.mxu0 %vm32_vm0, %v24_v7  ;;  %185 = vmatpush.xpose.msk.msra.mxu1 %vm32_vm0, %v24_v7 }
  0x22   :  { %189 = vmatpush.xpose.msk.msra.mxu2 %vm32_vm0, %v23_v8  ;;  %190 = vmatpush.xpose.msk.msra.mxu3 %vm32_vm0, %v23_v8 }
  0x23   :  { %152 = vmatpush.xpose.msk.msra.mxu0 %vm32_vm0, %v23_v8  ;;  %188 = vmatpush.xpose.msk.msra.mxu1 %vm32_vm0, %v23_v8 }
  0x26   :  { %192 = vmatpush.xpose.msk.msra.mxu2 %vm32_vm0, %v22_v9  ;;  %193 = vmatpush.xpose.msk.msra.mxu3 %vm32_vm0, %v22_v9 }
  0x27   :  { %153 = vmatpush.xpose.msk.msra.mxu0 %vm32_vm0, %v22_v9  ;;  %191 = vmatpush.xpose.msk.msra.mxu1 %vm32_vm0, %v22_v9 }
  0x2a   :  { %195 = vmatpush.xpose.msk.msra.mxu2 %vm32_vm0, %v21_v10  ;;  %196 = vmatpush.xpose.msk.msra.mxu3 %vm32_vm0, %v21_v10 }
  0x2b   :  { %154 = vmatpush.xpose.msk.msra.mxu0 %vm32_vm0, %v21_v10  ;;  %194 = vmatpush.xpose.msk.msra.mxu1 %vm32_vm0, %v21_v10 }
  0x2e   :  { %198 = vmatpush.xpose.msk.msra.mxu2 %vm32_vm0, %v20_v11  ;;  %199 = vmatpush.xpose.msk.msra.mxu3 %vm32_vm0, %v20_v11 }
  0x2f   :  { %155 = vmatpush.xpose.msk.msra.mxu0 %vm32_vm0, %v20_v11  ;;  %197 = vmatpush.xpose.msk.msra.mxu1 %vm32_vm0, %v20_v11 }
  0x32   :  { %201 = vmatpush.xpose.msk.msra.mxu2 %vm32_vm0, %v19_v12  ;;  %202 = vmatpush.xpose.msk.msra.mxu3 %vm32_vm0, %v19_v12 }
  0x33   :  { %156 = vmatpush.xpose.msk.msra.mxu0 %vm32_vm0, %v19_v12  ;;  %200 = vmatpush.xpose.msk.msra.mxu1 %vm32_vm0, %v19_v12 }
  0x36   :  { %204 = vmatpush.xpose.msk.msra.mxu2 %vm32_vm0, %v18_v13  ;;  %205 = vmatpush.xpose.msk.msra.mxu3 %vm32_vm0, %v18_v13 }
  0x37   :  { %157 = vmatpush.xpose.msk.msra.mxu0 %vm32_vm0, %v18_v13  ;;  %203 = vmatpush.xpose.msk.msra.mxu1 %vm32_vm0, %v18_v13 }
  0x3a   :  { %207 = vmatpush.xpose.msk.msra.mxu2 %vm32_vm0, %v17_v14  ;;  %208 = vmatpush.xpose.msk.msra.mxu3 %vm32_vm0, %v17_v14 }
  0x3b   :  { %158 = vmatpush.xpose.msk.msra.mxu0 %vm32_vm0, %v17_v14  ;;  %206 = vmatpush.xpose.msk.msra.mxu1 %vm32_vm0, %v17_v14 }
  0x3e   :  { %210 = vmatpush.xpose.msk.msra.mxu2 %vm32_vm0, %v16_v15  ;;  %211 = vmatpush.xpose.msk.msra.mxu3 %vm32_vm0, %v16_v15 }
  0x3f   :  { %159 = vmatpush.xpose.msk.msra.mxu0 %vm32_vm0, %v16_v15  ;;  %209 = vmatpush.xpose.msk.msra.mxu1 %vm32_vm0, %v16_v15 }
  0x41   :  { %162 = vmatmul.msk.f32.vlgmr.msra.gmra.mxu2 %vm32_vm0, %v14_v16  ;;  %163 = vmatmul.msk.f32.vlgmr.msra.gmra.mxu3 %vm32_vm0, %v15_v17 }
  0x42   :  { %160 = vmatmul.msk.f32.vlgmr.msra.gmra.mxu0 %vm32_vm0, %v12_v18  ;;  %161 = vmatmul.msk.f32.vlgmr.msra.gmra.mxu1 %vm32_vm0, %v13_v19 }
  0xbf   :  { %v110_v20 = vpop.f32.mrf.mxu0  ;;  %v113_v21 = vpop.f32.mrf.mxu1 }
  0xc0   :  { %122 = vst [vmem:[#allocation2] sm:$0xff] %v110_v20 }
  0xc1   :  { %123 = vst [vmem:[#allocation2 + $0x8] sm:$0xff] %v113_v21 }
  0xc4   :  { %v116_v22 = vpop.f32.mrf.mxu2  ;;  %v119_v23 = vpop.f32.mrf.mxu3 }
  0xc5   :  { %124 = vst [vmem:[#allocation2 + $0x10] sm:$0xff] %v116_v22 }
  0xc6   :  { %125 = vst [vmem:[#allocation2 + $0x18] sm:$0xff] %v119_v23 }
  0xc7   :  { %138 = dma.vmem_to_hbm [thread:$0]  %s131_s21, 512, %s133_s24, [#allocation3], %s242_s0, %s242_s0, %s243_s25  }
  0xc8   :  { %239 = dma.done.wait [#allocation3], 512  }
  0xc9   :  { %240 = vsyncadd [#allocation3], 4294966784 }
  0xca   :  { %143 = vsyncpa [#allocation3], 1 }

</bundles_post_ra>
